<compile_context>
chip_gen: v5e
topology: v5e:2x2
jax: 0.10.0
libtpu: 0.0.40
codegen_flags: <defaults>
</compile_context>

<pallas_src>
import numpy as np
import jax
import jax.numpy as jnp
from jax.experimental import pallas as pl
from jax.experimental.pallas import tpu as pltpu


def _round_up(x, m):
    return ((x + m - 1) // m) * m


def _decoder_kernel(xe_ref, oh_ref, bias_ref, o_ref, acc_ref):
    # xe_ref:   (1, C, TKN) VMEM  tap-weighted activations for batch b, contraction tile
    # oh_ref:   (TKN, TP)   VMEM  one-hot gather-matrix tile (batch independent)
    # bias_ref: (C, 1)      VMEM  conv bias
    # o_ref:    (1, C, TP)  VMEM  output tile (lane-dense, single 2-D store)
    # acc_ref:  (C, TP)     VMEM  f32 accumulator over the K*N reduction grid axis
    kn = pl.program_id(2)

    @pl.when(kn == 0)
    def _init():
        acc_ref[...] = jnp.zeros_like(acc_ref)

    # One MXU matmul per grid step; f32 accumulation.
    acc_ref[...] += jnp.dot(xe_ref[0], oh_ref[...],
                            preferred_element_type=jnp.float32)

    @pl.when(kn == pl.num_programs(2) - 1)
    def _finalize():
        o_ref[0] = (acc_ref[...] + bias_ref[...]).astype(o_ref.dtype)


def idg2erp_decoder_forward(x, seqnumkmin, weight, bias, *, q=10, max_j,
                            tile_p=512, tile_kn=512):
    """x: (B*q, C, h, w) NCHW; returns (B, C, P//max_j, max_j)."""
    bq, C, h, w = x.shape
    B = bq // q
    N = q * h * w
    P, K = seqnumkmin.shape
    KN = K * N
    assert P % max_j == 0
    assert tile_p % 128 == 0 and tile_kn % 128 == 0

    tp = min(tile_p, P)
    assert P % tp == 0, "P must be a multiple of the ERP-point tile"
    tkn = tile_kn if KN >= tile_kn else _round_up(KN, 128)
    knp = _round_up(KN, tkn)                       # padded contraction length

    # ---------------- wrapper glue (plain JAX, outside the hot loop) ----------------
    # rearrange '(b q) c h w -> b c (q h w)'
    xf = x.reshape(B, q, C, h, w).transpose(0, 2, 1, 3, 4).reshape(B, C, N)
    xf = xf.astype(jnp.float32)
    wt = weight.astype(jnp.float32)

    # Fold the depthwise-conv taps into the contraction dim:
    #   xe[b, c, j*N + n] = weight[c, j] * x[b, c, n]
    xe = (wt[None, :, :, None] * xf[:, :, None, :]).reshape(B, C, KN)

    # Batch-independent one-hot gather matrix (could be cached across forward calls):
    #   oh[j*N + n, p] = 1.0  iff  seqnumkmin[p, j] == n
    oh = (seqnumkmin[:, :, None] ==
          jnp.arange(N, dtype=seqnumkmin.dtype)[None, None, :])      # (P, K, N) bool
    oh = oh.astype(jnp.float32).transpose(1, 2, 0).reshape(KN, P)    # (K*N, P)

    if knp != KN:   # zero-pad the contraction axis; padding contributes exactly 0
        xe = jnp.pad(xe, ((0, 0), (0, 0), (0, knp - KN)))
        oh = jnp.pad(oh, ((0, knp - KN), (0, 0)))

    bias2d = bias.astype(jnp.float32).reshape(C, 1)

    # VMEM budget (double-buffered input/output blocks + accumulator), with headroom.
    block_bytes = 4 * (2 * C * tkn + 2 * tkn * tp + 2 * C * tp + 2 * C + C * tp)
    vmem_limit = int(min(48 * 2**20, max(16 * 2**20, 4 * block_bytes)))

    grid = (B, P // tp, knp // tkn)

    out_flat = pl.pallas_call(
        _decoder_kernel,
        out_shape=jax.ShapeDtypeStruct((B, C, P), jnp.float32),
        grid_spec=pltpu.PrefetchScalarGridSpec(
            num_scalar_prefetch=0,
            grid=grid,
            in_specs=[
                pl.BlockSpec((1, C, tkn), lambda b, p, k: (b, 0, k)),  # xe tile
                pl.BlockSpec((tkn, tp), lambda b, p, k: (k, p)),       # gather-matrix tile
                pl.BlockSpec((C, 1), lambda b, p, k: (0, 0)),          # bias
            ],
            out_specs=pl.BlockSpec((1, C, tp), lambda b, p, k: (b, 0, p)),
            scratch_shapes=[pltpu.VMEM((C, tp), jnp.float32)],
        ),
        compiler_params=pltpu.CompilerParams(
            dimension_semantics=("parallel", "parallel", "arbitrary"),
            vmem_limit_bytes=vmem_limit,
        ),
    )(xe, oh, bias2d)

    # rearrange 'b c (h w) -> b c h w' with w = MaxJ   (glue)
    return out_flat.reshape(B, C, P // max_j, max_j)


if __name__ == "__main__":
    # Small shapes consistent with the module: q=10 icosahedral diamonds fixed by forward().
    B, q, C, h, w = 2, 10, 2, 4, 4
    K = 3                       # k_size -> Conv2d kernel (1, K), groups=C
    delta = 11.25
    MaxJ = int(360 / delta)     # 32
    MaxI = int(180 / delta)     # 16
    P = MaxI * MaxJ             # 512 ERP points
    N = q * h * w               # 160 icosahedral grid points

    key = jax.random.PRNGKey(0)
    k1, k2, k3, k4 = jax.random.split(key, 4)

    x = jax.random.normal(k1, (B * q, C, h, w), jnp.float32)

    # TODO(synk): real module builds seqnumkmin from get_ico2erp_table (DGGRID geometry);
    # here we use a deterministic synthetic k-nearest-neighbour table (already 0-based).
    seqnumkmin = jax.random.randint(k2, (P, K), 0, N, dtype=jnp.int32)

    # Depthwise Conv2d(C, C, (1, K), groups=C): weight (C, 1, 1, K) -> stored as (C, K).
    weight = (jax.random.normal(k3, (C, K), jnp.float32) * 0.1).astype(jnp.float32)
    bias = (jax.random.normal(k4, (C,), jnp.float32) * 0.1).astype(jnp.float32)

    out = idg2erp_decoder_forward(x, seqnumkmin, weight, bias, q=q, max_j=MaxJ)
    out = jax.block_until_ready(out)

    # Pure-JAX reference (exact f32 gather + elementwise tap sum, no dot precision ambiguity).
    xf = x.reshape(B, q, C, h, w).transpose(0, 2, 1, 3, 4).reshape(B, C, N)
    xg = xf[:, :, seqnumkmin]                                        # (B, C, P, K)
    ref = (xg * weight[None, :, None, :]).sum(-1) + bias[None, :, None]
    ref = ref.reshape(B, C, MaxI, MaxJ)

    assert out.shape == (B, C, MaxI, MaxJ), out.shape
    # Tolerance note: inputs stay f32 with f32 accumulation; if this TPU generation runs
    # the f32 MXU contraction at reduced (bf16-based) multiply precision the per-point
    # error is ~1e-3 worst case, otherwise ~1e-6.  Any gather/weight-mapping bug would
    # produce O(0.1) errors, far above this bound.
    np.testing.assert_allclose(np.asarray(out), np.asarray(ref), rtol=1e-2, atol=5e-3)
    print("KERNEL_OK")
</pallas_src>

<mosaic_0001>
module attributes {stable_mosaic.version = 11 : i64} {
  func.func @_decoder_kernel(%arg0: i32, %arg1: i32, %arg2: i32, %arg3: memref<1x2x512xf32, #tpu.memory_space<vmem>>, %arg4: memref<512x512xf32, #tpu.memory_space<vmem>>, %arg5: memref<2x1xf32, #tpu.memory_space<vmem>>, %arg6: memref<1x2x512xf32, #tpu.memory_space<vmem>>, %arg7: memref<2x512xf32, #tpu.memory_space<vmem>>) attributes {dimension_semantics = [#tpu.dimension_semantics<parallel>, #tpu.dimension_semantics<parallel>, #tpu.dimension_semantics<arbitrary>], iteration_bounds = array<i64: 2, 1, 1>, scalar_prefetch = 0 : i64, scratch_operands = 1 : i64, tpu.core_type = #tpu.core_type<tc>, window_params = [{transform_indices = @transform_0, window_bounds = array<i64: 1, 2, 512>}, {transform_indices = @transform_1, window_bounds = array<i64: 512, 512>}, {pipeline_mode = #tpu.pipeline_mode<synchronous>, transform_indices = @transform_2, window_bounds = array<i64: 2, 1>}, {transform_indices = @transform_3, window_bounds = array<i64: 1, 2, 512>}]} {
    %c0_i32 = arith.constant 0 : i32
    %0 = arith.cmpi eq, %arg2, %c0_i32 : i32
    %1 = arith.extui %0 : i1 to i32
    %c0_i32_0 = arith.constant 0 : i32
    %2 = arith.cmpi ne, %1, %c0_i32_0 : i32
    scf.if %2 {
      %cst_11 = arith.constant 0.000000e+00 : f32
      %13 = vector.broadcast %cst_11 : f32 to vector<2x512xf32>
      %c0_12 = arith.constant 0 : index
      %c0_13 = arith.constant 0 : index
      %14 = vector.load %arg7[%c0_12, %c0_13] : memref<2x512xf32, #tpu.memory_space<vmem>>, vector<2x512xf32>
      tpu.vector_store %arg7[%c0_12, %c0_13], %13 {strides = array<i32>} : memref<2x512xf32, #tpu.memory_space<vmem>>, vector<2x512xf32>,
    } else {
    }
    %c0 = arith.constant 0 : index
    %c0_1 = arith.constant 0 : index
    %3 = vector.load %arg7[%c0, %c0_1] : memref<2x512xf32, #tpu.memory_space<vmem>>, vector<2x512xf32>
    %c0_2 = arith.constant 0 : index
    %c0_3 = arith.constant 0 : index
    %c0_4 = arith.constant 0 : index
    %4 = vector.load %arg3[%c0_2, %c0_3, %c0_4] : memref<1x2x512xf32, #tpu.memory_space<vmem>>, vector<1x2x512xf32>
    %5 = vector.shape_cast %4 : vector<1x2x512xf32> to vector<2x512xf32>
    %c0_5 = arith.constant 0 : index
    %c0_6 = arith.constant 0 : index
    %6 = vector.load %arg4[%c0_5, %c0_6] : memref<512x512xf32, #tpu.memory_space<vmem>>, vector<512x512xf32>
    %cst = arith.constant dense<0.000000e+00> : vector<2x512xf32>
    %7 = tpu.matmul %5, %6, %cst {dimension_numbers = #tpu.dot_dimension_numbers<[1], [0], [0], [1], [0, 0, 1, 1], [], []>} : vector<2x512xf32>, vector<512x512xf32>, vector<2x512xf32> -> vector<2x512xf32>
    %8 = arith.addf %3, %7 : vector<2x512xf32>
    %c0_7 = arith.constant 0 : index
    %c0_8 = arith.constant 0 : index
    %9 = vector.load %arg7[%c0_7, %c0_8] : memref<2x512xf32, #tpu.memory_space<vmem>>, vector<2x512xf32>
    tpu.vector_store %arg7[%c0_7, %c0_8], %8 {strides = array<i32>} : memref<2x512xf32, #tpu.memory_space<vmem>>, vector<2x512xf32>,
    %c0_i32_9 = arith.constant 0 : i32
    %10 = arith.cmpi eq, %arg2, %c0_i32_9 : i32
    %11 = arith.extui %10 : i1 to i32
    %c0_i32_10 = arith.constant 0 : i32
    %12 = arith.cmpi ne, %11, %c0_i32_10 : i32
    scf.if %12 {
      %c0_11 = arith.constant 0 : index
      %c0_12 = arith.constant 0 : index
      %13 = vector.load %arg7[%c0_11, %c0_12] : memref<2x512xf32, #tpu.memory_space<vmem>>, vector<2x512xf32>
      %c0_13 = arith.constant 0 : index
      %c0_14 = arith.constant 0 : index
      %14 = vector.load %arg5[%c0_13, %c0_14] : memref<2x1xf32, #tpu.memory_space<vmem>>, vector<2x1xf32>
      %15 = vector.broadcast %14 : vector<2x1xf32> to vector<2x512xf32>
      %16 = arith.addf %13, %15 : vector<2x512xf32>
      %c0_15 = arith.constant 0 : index
      %c0_16 = arith.constant 0 : index
      %c0_17 = arith.constant 0 : index
      %17 = vector.load %arg6[%c0_15, %c0_16, %c0_17] : memref<1x2x512xf32, #tpu.memory_space<vmem>>, vector<1x2x512xf32>
      %18 = vector.shape_cast %17 : vector<1x2x512xf32> to vector<2x512xf32>
      %19 = vector.shape_cast %16 : vector<2x512xf32> to vector<1x2x512xf32>
      tpu.vector_store %arg6[%c0_15, %c0_16, %c0_17], %19 {strides = array<i32>} : memref<1x2x512xf32, #tpu.memory_space<vmem>>, vector<1x2x512xf32>,
    } else {
    }
    return
  }
  func.func @transform_0(%arg0: i32, %arg1: i32, %arg2: i32) -> (i32, i32, i32) {
    %c0_i32 = arith.constant 0 : i32
    %c0_i32_0 = arith.constant 0 : i32
    return %arg0, %c0_i32, %arg2 : i32, i32, i32
  }
  func.func @transform_1(%arg0: i32, %arg1: i32, %arg2: i32) -> (i32, i32) {
    %c0_i32 = arith.constant 0 : i32
    return %arg2, %arg1 : i32, i32
  }
  func.func @transform_2(%arg0: i32, %arg1: i32, %arg2: i32) -> (i32, i32) {
    %c0_i32 = arith.constant 0 : i32
    %c0_i32_0 = arith.constant 0 : i32
    %c0_i32_1 = arith.constant 0 : i32
    return %c0_i32, %c0_i32_0 : i32, i32
  }
  func.func @transform_3(%arg0: i32, %arg1: i32, %arg2: i32) -> (i32, i32, i32) {
    %c0_i32 = arith.constant 0 : i32
    %c0_i32_0 = arith.constant 0 : i32
    return %arg0, %c0_i32, %arg1 : i32, i32, i32
  }
}

</mosaic_0001>

<bundles_post_ra>
// kernel: tpu_custom_call.1
= control target key start
LH: loop header
LB: loop body
LE: loop exit
PB: predicated region body
PF: predicated region fallthrough
CT: control target
= control target key end

     0   :  { %8 = vsyncpa [#allocation4], 0  ;;  %s1441_s0 = inlined_call_operand.hbm [shape: f32[2,2,512], index: 0, kind: input, shape index: {}]   ;;  %s1442_s1 = inlined_call_operand.hbm [shape: f32[512,512], index: 1, kind: input, shape index: {}]   ;;  %s1443_s2 = inlined_call_operand.vmem [shape: f32[2,1], index: 2, kind: input, shape index: {}]   ;;  %s1444_s3 = inlined_call_operand.hbm [shape: f32[2,2,512], index: 3, kind: output, shape index: {}]  }
   0x1   :  { %10 = vsyncpa [#allocation4 + $0x1], 0 }
   0x2   :  { %11 = vsyncpa [#allocation7], 0 }
   0x3   :  { %12 = vsyncpa [#allocation5], 0 }
   0x4   :  { %14 = vsyncpa [#allocation5 + $0x1], 0  ;;  %s1264_s12 = smov 0   ;;  %s1266_s13 = smov 0  }
   0x5   :  { %s1268_s14 = smov 0   ;;  %s1270_s15 = smov 0  }
   0x6   :  { %s1272_s16 = smov 0   ;;  %s1274_s17 = smov 0  }
   0x7 LB: > { %s994_s18 = sadd.s32 4294967295, %s1237_s17   ;;  %p996_p0 = scmp.ge.s32.totalorder %s1237_s17, 1  ;;  %s1237_s17 = sphi %s1274_s17, %s20_s17   ;;  %s1233_s16 = sphi %s1272_s16, %s1455_s16   ;;  %s1229_s15 = sphi %s1270_s15, %s1454_s15   ;;  %s1225_s14 = sphi %s1268_s14, %s1453_s14   ;;  %s1221_s13 = sphi %s1266_s13, %s1452_s13   ;;  %s1217_s12 = sphi %s1264_s12, %s1451_s12  }
   0x8   : > { %p1296_p1 = scmp.eq.s32.totalorder %s994_s18, 0  ;;  %p149_p2 = scmp.lt.s32.totalorder %s1237_s17, 3 }
   0x9   : > { %s166_s22 = sshll.u32 %s1442_s1, 4  ;;  %s1239_s24 = smov [#allocation6]   ;;  %s167_s22 = int_to_ptr.hbm [resolvable:$true] %s166_s22 }
   0xa   : > { %p1304_p3 = pnand %p996_p0, %p149_p2  ;;  %s168_s25 = sshll.u32 %s1239_s24, 4  ;;  %s169_s25 = int_to_ptr.vmem [resolvable:$true] %s168_s25 }
   0xb   : > { %p998_p6 = scmp.ge.s32.totalorder %s1237_s17, 2  ;;  %s1240_s26 = smov 512  }
   0xc   : > { %p1021_p4 = pneg %p1304_p3  ;;  %s1241_s27 = smov 32  }
   0xd   : > { %s995_s28 = sadd.s32 4294967294, %s1237_s17   ;;  %s39_s29 = sadd.s32 1, %s1233_s16 }
   0xe   : > { %p1022_p5 = pnand %p1021_p4, %p1296_p1  ;;  %s48_s30 = sadd.s32 1, %s1225_s14 }
   0xf   : > { %p41_p7 = scmp.ge.s32.totalorder %s39_s29, 2  ;;  %p55_p8 = scmp.ne.s32.totalorder %s1225_s14, %s1221_s13 }
  0x10   : > { %1024 = dma.hbm_to_vmem [thread:$0]  (!%p1022_p5), %s167_s22, 32768, %s169_s25, [#allocation7], %s1240_s26, %s1240_s26, %s1241_s27  }
  0x11   : > { %p56_p9 = scmp.eq.s32.totalorder %s1237_s17, 0  ;;  %p61_p10 = scmp.ne.s32.totalorder %s1221_s13, %s1217_s12 }
  0x12   : > { %s1457_s29 = smov (%p41_p7, %s39_s29), 0  ;;  %p136_p13 = scmp.eq.s32.totalorder %s994_s18, 1 }
  0x13   : > { %p1323_p11 = por %p56_p9, %p55_p8  ;;  %p1329_p12 = por %p1296_p1, %p61_p10 }
  0x14   : > { %s43_s6 = ssub.s32 %s1233_s16, %s1457_s29  ;;  %p142_p2 = scmp.eq.s32.totalorder %s995_s28, 1 }
  0x15   : > { %p46_p0 = scmp.eq.s32.totalorder %s43_s6, 0  ;;  %p1335_p4 = por %p136_p13, %p55_p8 }
  0x16   : > { %p1034_p5 = scmp.lt.s32.totalorder %s1237_s17, 2  ;;  %p1343_p7 = por %p142_p2, %p61_p10 }
  0x17   : > { %s1341_s8 = scalar_select %p46_p0, %s1225_s14, %s48_s30  }
  0x18   : > { %s185_s10 = sand.u32 1, %s1225_s14   ;;  %s1011_s20 = sshll.u32 %s1233_s16, 3 }
  0x19   : > { %s999_s11 = sshll.u32 %s185_s10, 3  ;;  %s196_s18 = scalar_lea.hbm %s1441_s0, %s1011_s20 }
  0x1a   : > { %s189_s24 = scalar_lea.vmem [#allocation3], %s999_s11  ;;  %s198_s26 = sshll.u32 %s196_s18, 4  ;;  %s199_s26 = int_to_ptr.hbm [resolvable:$true] %s198_s26 }
  0x1b   : > { %s200_s25 = sshll.u32 %s189_s24, 4  ;;  %p1026_p8 = pnand %p1034_p5, %p1323_p11  ;;  %s201_s25 = int_to_ptr.vmem [resolvable:$true] %s200_s25 }
  0x1c   : > { %s186_s27 = scalar_lea.sflag [#allocation4], %s185_s10  ;;  %209 = sbr.rel (%p1304_p3) target bundleno = 344 (0x158), region = 32 }
  0x1d   : > { %1028 = dma.hbm_to_vmem [thread:$0]  (!%p1026_p8), %s199_s26, 128, %s201_s25, %s186_s27  }
  0x1e   : > { %s1357_s28 = sand.u32 (!%p1304_p3), 1, %s1221_s13  }
  0x1f   : > { %s1003_s30 = sshll.u32 (!%p1304_p3), %s1357_s28, 3  ;;  %s212_s6 = scalar_lea.sflag (!%p1304_p3), [#allocation4], %s1357_s28 }
  0x20   : > { %s1363_s11 = scalar_lea.vmem (!%p1304_p3), [#allocation3], %s1003_s30 }
  0x21   : > { %1204 = dma.done.wait (%p1329_p12), %s212_s6, 128  }
  0x22   : > { %1206 = vsyncadd (%p1329_p12), %s212_s6, 4294967168 }
  0x23   : > { %1208 = dma.done.wait (%p1296_p1), [#allocation7], 32768  }
  0x24   : > { %1210 = vsyncadd (%p1296_p1), [#allocation7], 4294934528  ;;  %v443_v0 = vld [vmem:[#allocation6 + $0x5e0] sm:$0xff]  ;;  %v444_v62 = vld [vmem:[#allocation6 + $0x5e8] sm:$0xff]  ;;  %s1012_s4 = sshll.u32 %s1229_s15, 3  ;;  %vm848_vm0 = vcmask 1041408  }
  0x25   : > { %v439_v1 = vld [vmem:[#allocation6 + $0x5c0] sm:$0xff]  ;;  %561 = vmatpush.msra.mxu2 %v443_v0  ;;  %v508_v63 = vld [vmem:[#allocation6 + $0x7e8] sm:$0xff]  ;;  %s887_s20 = scalar_lea.hbm %s1444_s3, %s1012_s4  ;;  %vm850_vm1 = vcmask 1045508   ;;  %vm852_vm2 = vcmask 1043456   ;;  %s243_s15 = scalar_lea.vmem [#allocation8], %s1003_s30 }
  0x26   : > { %v507_v2 = vld [vmem:[#allocation6 + $0x7e0] sm:$0xff]  ;;  %s889_s21 = sshll.u32 %s243_s15, 4  ;;  %s891_s22 = sshll.u32 %s887_s20, 4  ;;  %s890_s21 = int_to_ptr.vmem [resolvable:$true] %s889_s21  ;;  %s892_s22 = int_to_ptr.hbm [resolvable:$true] %s891_s22 }
  0x27   : > { %581 = vmatpush.msra.mxu3 %v507_v2  ;;  %v315_v3 = vld [vmem:[#allocation6 + $0x1e0] sm:$0xff]  ;;  %562 = vmatpush.msra.mxu2 %v439_v1  ;;  %v440_v2 = vld [vmem:[#allocation6 + $0x5c8] sm:$0xff]  ;;  %s874_s18 = scalar_lea.sflag [#allocation5], %s1357_s28  ;;  %s1165_s24 = sshra.s32 %s892_s22, 4  ;;  %s1166_s24 = int_to_ptr.hbm [resolvable:$true] %s1165_s24 }
  0x28   : > { %v379_v4 = vld [vmem:[#allocation6 + $0x3e0] sm:$0xff]  ;;  %521 = vmatpush.msra.mxu0 %v315_v3  ;;  %v316_v3 = vld [vmem:[#allocation6 + $0x1e8] sm:$0xff]  ;;  %s1167_s25 = scalar_lea.hbm %s1166_s24, 8  ;;  %s1171_s30 = scalar_lea.hbm %s1444_s3, 16 }
  0x29   : > { %v435_v5 = vld [vmem:[#allocation6 + $0x5a0] sm:$0xff]  ;;  %541 = vmatpush.msra.mxu1 %v379_v4  ;;  %v380_v4 = vld [vmem:[#allocation6 + $0x3e8] sm:$0xff]  ;;  %p1168_p1 = scmp.ne.s32.totalorder %s1166_s24, %s1167_s25  ;;  %p1172_p10 = scmp.lt.s32.totalorder %s1166_s24, %s1444_s3 }
  0x2a   : > { %v503_v6 = vld [vmem:[#allocation6 + $0x7c0] sm:$0xff]  ;;  %563 = vmatpush.msra.mxu2 %v435_v5  ;;  %v504_v5 = vld [vmem:[#allocation6 + $0x7c8] sm:$0xff]  ;;  %p1173_p11 = scmp.lt.s32.totalorder %s1171_s30, %s1167_s25 }
  0x2b   : > { %v311_v7 = vld [vmem:[#allocation6 + $0x1c0] sm:$0xff]  ;;  %582 = vmatpush.msra.mxu3 %v503_v6  ;;  %v436_v6 = vld [vmem:[#allocation6 + $0x5a8] sm:$0xff]  ;;  %p1169_p3 = pnand %p1168_p1, %p1335_p4 }
  0x2c   : > { %v375_v8 = vld [vmem:[#allocation6 + $0x3c0] sm:$0xff]  ;;  %522 = vmatpush.msra.mxu0 %v311_v7  ;;  %v312_v7 = vld [vmem:[#allocation6 + $0x1c8] sm:$0xff]  ;;  %p1174_p12 = por %p1173_p11, %p1172_p10 }
  0x2d   : > { %v499_v9 = vld [vmem:[#allocation6 + $0x7a0] sm:$0xff]  ;;  %542 = vmatpush.msra.mxu1 %v375_v8  ;;  %v376_v8 = vld [vmem:[#allocation6 + $0x3c8] sm:$0xff]  ;;  %p1170_p9 = pneg %p1169_p3 }
  0x2e   : > { %v307_v10 = vld [vmem:[#allocation6 + $0x1a0] sm:$0xff]  ;;  %583 = vmatpush.msra.mxu3 %v499_v9  ;;  %v500_v9 = vld [vmem:[#allocation6 + $0x7a8] sm:$0xff] }
  0x2f   : > { %v431_v11 = vld [vmem:[#allocation6 + $0x580] sm:$0xff]  ;;  %523 = vmatpush.msra.mxu0 %v307_v10  ;;  %v432_v10 = vld [vmem:[#allocation6 + $0x588] sm:$0xff]  ;;  %p1175_p13 = pnand %p1174_p12, %p1170_p9 }
  0x30   : > { %v371_v12 = vld [vmem:[#allocation6 + $0x3a0] sm:$0xff]  ;;  %564 = vmatpush.msra.mxu2 %v431_v11  ;;  %v308_v11 = vld [vmem:[#allocation6 + $0x1a8] sm:$0xff] }
  0x31   : > { %v495_v13 = vld [vmem:[#allocation6 + $0x780] sm:$0xff]  ;;  %543 = vmatpush.msra.mxu1 %v371_v12  ;;  %v254_v12 = vld [vmem:[%s1363_s11] sm:$0xff] }
  0x32   : > { %v303_v14 = vld [vmem:[#allocation6 + $0x180] sm:$0xff]  ;;  %584 = vmatpush.msra.mxu3 %v495_v13  ;;  %v372_v13 = vld [vmem:[#allocation6 + $0x3a8] sm:$0xff]  ;;  %512 = vst [vmem:[#allocation1] ss:$4 sm:$0xff] %v254_v12  ;;  %v313_v12 = vld [vmem:[#allocation6 + $0x1d0] sm:$0xff] }
  0x33   : > { %v367_v15 = vld [vmem:[#allocation6 + $0x380] sm:$0xff]  ;;  %524 = vmatpush.msra.mxu0 %v303_v14  ;;  %v496_v14 = vld [vmem:[#allocation6 + $0x788] sm:$0xff] }
  0x34   : > { %v427_v16 = vld [vmem:[#allocation6 + $0x560] sm:$0xff]  ;;  %544 = vmatpush.msra.mxu1 %v367_v15  ;;  %v428_v15 = vld [vmem:[#allocation6 + $0x568] sm:$0xff] }
  0x35   : > { %v491_v17 = vld [vmem:[#allocation6 + $0x760] sm:$0xff]  ;;  %565 = vmatpush.msra.mxu2 %v427_v16  ;;  %v304_v16 = vld [vmem:[#allocation6 + $0x188] sm:$0xff] }
  0x36   : > { %v299_v18 = vld [vmem:[#allocation6 + $0x160] sm:$0xff]  ;;  %585 = vmatpush.msra.mxu3 %v491_v17  ;;  %v368_v17 = vld [vmem:[#allocation6 + $0x388] sm:$0xff] }
  0x37   : > { %v363_v19 = vld [vmem:[#allocation6 + $0x360] sm:$0xff]  ;;  %525 = vmatpush.msra.mxu0 %v299_v18  ;;  %v492_v18 = vld [vmem:[#allocation6 + $0x768] sm:$0xff] }
  0x38   : > { %v423_v20 = vld [vmem:[#allocation6 + $0x540] sm:$0xff]  ;;  %545 = vmatpush.msra.mxu1 %v363_v19  ;;  %v424_v19 = vld [vmem:[#allocation6 + $0x548] sm:$0xff] }
  0x39   : > { %v487_v21 = vld [vmem:[#allocation6 + $0x740] sm:$0xff]  ;;  %566 = vmatpush.msra.mxu2 %v423_v20  ;;  %v300_v20 = vld [vmem:[#allocation6 + $0x168] sm:$0xff] }
  0x3a   : > { %v295_v22 = vld [vmem:[#allocation6 + $0x140] sm:$0xff]  ;;  %586 = vmatpush.msra.mxu3 %v487_v21  ;;  %v364_v21 = vld [vmem:[#allocation6 + $0x368] sm:$0xff] }
  0x3b   : > { %v359_v23 = vld [vmem:[#allocation6 + $0x340] sm:$0xff]  ;;  %526 = vmatpush.msra.mxu0 %v295_v22  ;;  %v488_v22 = vld [vmem:[#allocation6 + $0x748] sm:$0xff] }
  0x3c   : > { %v419_v24 = vld [vmem:[#allocation6 + $0x520] sm:$0xff]  ;;  %546 = vmatpush.msra.mxu1 %v359_v23  ;;  %v420_v23 = vld [vmem:[#allocation6 + $0x528] sm:$0xff] }
  0x3d   : > { %v483_v25 = vld [vmem:[#allocation6 + $0x720] sm:$0xff]  ;;  %567 = vmatpush.msra.mxu2 %v419_v24  ;;  %v296_v24 = vld [vmem:[#allocation6 + $0x148] sm:$0xff] }
  0x3e   : > { %v291_v26 = vld [vmem:[#allocation6 + $0x120] sm:$0xff]  ;;  %587 = vmatpush.msra.mxu3 %v483_v25  ;;  %v360_v25 = vld [vmem:[#allocation6 + $0x348] sm:$0xff] }
  0x3f   : > { %v355_v27 = vld [vmem:[#allocation6 + $0x320] sm:$0xff]  ;;  %527 = vmatpush.msra.mxu0 %v291_v26  ;;  %v484_v26 = vld [vmem:[#allocation6 + $0x728] sm:$0xff] }
  0x40   : > { %v415_v28 = vld [vmem:[#allocation6 + $0x500] sm:$0xff]  ;;  %547 = vmatpush.msra.mxu1 %v355_v27  ;;  %v416_v27 = vld [vmem:[#allocation6 + $0x508] sm:$0xff] }
  0x41   : > { %v479_v29 = vld [vmem:[#allocation6 + $0x700] sm:$0xff]  ;;  %568 = vmatpush.msra.mxu2 %v415_v28  ;;  %v292_v28 = vld [vmem:[#allocation6 + $0x128] sm:$0xff] }
  0x42   : > { %v287_v30 = vld [vmem:[#allocation6 + $0x100] sm:$0xff]  ;;  %588 = vmatpush.msra.mxu3 %v479_v29  ;;  %v356_v29 = vld [vmem:[#allocation6 + $0x328] sm:$0xff] }
  0x43   : > { %v351_v31 = vld [vmem:[#allocation6 + $0x300] sm:$0xff]  ;;  %528 = vmatpush.msra.mxu0 %v287_v30  ;;  %v480_v30 = vld [vmem:[#allocation6 + $0x708] sm:$0xff] }
  0x44   : > { %v411_v32 = vld [vmem:[#allocation6 + $0x4e0] sm:$0xff]  ;;  %548 = vmatpush.msra.mxu1 %v351_v31  ;;  %v412_v31 = vld [vmem:[#allocation6 + $0x4e8] sm:$0xff] }
  0x45   : > { %v475_v33 = vld [vmem:[#allocation6 + $0x6e0] sm:$0xff]  ;;  %569 = vmatpush.msra.mxu2 %v411_v32  ;;  %v288_v32 = vld [vmem:[#allocation6 + $0x108] sm:$0xff] }
  0x46   : > { %v283_v34 = vld [vmem:[#allocation6 + $0xe0] sm:$0xff]  ;;  %589 = vmatpush.msra.mxu3 %v475_v33  ;;  %v352_v33 = vld [vmem:[#allocation6 + $0x308] sm:$0xff] }
  0x47   : > { %v347_v35 = vld [vmem:[#allocation6 + $0x2e0] sm:$0xff]  ;;  %529 = vmatpush.msra.mxu0 %v283_v34  ;;  %v476_v34 = vld [vmem:[#allocation6 + $0x6e8] sm:$0xff] }
  0x48   : > { %v407_v36 = vld [vmem:[#allocation6 + $0x4c0] sm:$0xff]  ;;  %549 = vmatpush.msra.mxu1 %v347_v35  ;;  %v408_v35 = vld [vmem:[#allocation6 + $0x4c8] sm:$0xff] }
  0x49   : > { %v471_v37 = vld [vmem:[#allocation6 + $0x6c0] sm:$0xff]  ;;  %570 = vmatpush.msra.mxu2 %v407_v36  ;;  %v284_v36 = vld [vmem:[#allocation6 + $0xe8] sm:$0xff] }
  0x4a   : > { %v279_v38 = vld [vmem:[#allocation6 + $0xc0] sm:$0xff]  ;;  %590 = vmatpush.msra.mxu3 %v471_v37  ;;  %v348_v37 = vld [vmem:[#allocation6 + $0x2e8] sm:$0xff] }
  0x4b   : > { %v343_v39 = vld [vmem:[#allocation6 + $0x2c0] sm:$0xff]  ;;  %530 = vmatpush.msra.mxu0 %v279_v38  ;;  %v472_v38 = vld [vmem:[#allocation6 + $0x6c8] sm:$0xff] }
  0x4c   : > { %v403_v40 = vld [vmem:[#allocation6 + $0x4a0] sm:$0xff]  ;;  %550 = vmatpush.msra.mxu1 %v343_v39  ;;  %v404_v39 = vld [vmem:[#allocation6 + $0x4a8] sm:$0xff] }
  0x4d   : > { %v467_v41 = vld [vmem:[#allocation6 + $0x6a0] sm:$0xff]  ;;  %571 = vmatpush.msra.mxu2 %v403_v40  ;;  %v280_v40 = vld [vmem:[#allocation6 + $0xc8] sm:$0xff] }
  0x4e   : > { %v275_v42 = vld [vmem:[#allocation6 + $0xa0] sm:$0xff]  ;;  %591 = vmatpush.msra.mxu3 %v467_v41  ;;  %v344_v41 = vld [vmem:[#allocation6 + $0x2c8] sm:$0xff] }
  0x4f   : > { %v339_v43 = vld [vmem:[#allocation6 + $0x2a0] sm:$0xff]  ;;  %531 = vmatpush.msra.mxu0 %v275_v42  ;;  %v468_v42 = vld [vmem:[#allocation6 + $0x6a8] sm:$0xff] }
  0x50   : > { %v399_v44 = vld [vmem:[#allocation6 + $0x480] sm:$0xff]  ;;  %551 = vmatpush.msra.mxu1 %v339_v43  ;;  %v400_v43 = vld [vmem:[#allocation6 + $0x488] sm:$0xff] }
  0x51   : > { %v463_v45 = vld [vmem:[#allocation6 + $0x680] sm:$0xff]  ;;  %572 = vmatpush.msra.mxu2 %v399_v44  ;;  %v276_v44 = vld [vmem:[#allocation6 + $0xa8] sm:$0xff] }
  0x52   : > { %v271_v46 = vld [vmem:[#allocation6 + $0x80] sm:$0xff]  ;;  %592 = vmatpush.msra.mxu3 %v463_v45  ;;  %v1374_v45 = vld.sshfl [vmem:[#allocation1 + $0x10] sm:$0xff pattern:$0x73625140] }
  0x53   : > { %v335_v47 = vld [vmem:[#allocation6 + $0x280] sm:$0xff]  ;;  %532 = vmatpush.msra.mxu0 %v271_v46  ;;  %v340_v46 = vld [vmem:[#allocation6 + $0x2a8] sm:$0xff] }
  0x54   : > { %v395_v48 = vld [vmem:[#allocation6 + $0x460] sm:$0xff]  ;;  %552 = vmatpush.msra.mxu1 %v335_v47  ;;  %v396_v47 = vld [vmem:[#allocation6 + $0x468] sm:$0xff] }
  0x55   : > { %v459_v49 = vld [vmem:[#allocation6 + $0x660] sm:$0xff]  ;;  %573 = vmatpush.msra.mxu2 %v395_v48  ;;  %v464_v48 = vld [vmem:[#allocation6 + $0x688] sm:$0xff] }
  0x56   : > { %v267_v50 = vld [vmem:[#allocation6 + $0x60] sm:$0xff]  ;;  %593 = vmatpush.msra.mxu3 %v459_v49 }
  0x57   : > { %v331_v51 = vld [vmem:[#allocation6 + $0x260] sm:$0xff]  ;;  %533 = vmatpush.msra.mxu0 %v267_v50  ;;  %v272_v50 = vld [vmem:[#allocation6 + $0x88] sm:$0xff] }
  0x58   : > { %v391_v52 = vld [vmem:[#allocation6 + $0x440] sm:$0xff]  ;;  %553 = vmatpush.msra.mxu1 %v331_v51  ;;  %v336_v51 = vld [vmem:[#allocation6 + $0x288] sm:$0xff] }
  0x59   : > { %v455_v53 = vld [vmem:[#allocation6 + $0x640] sm:$0xff]  ;;  %574 = vmatpush.msra.mxu2 %v391_v52  ;;  %v392_v52 = vld [vmem:[#allocation6 + $0x448] sm:$0xff] }
  0x5a   : > { %v263_v54 = vld [vmem:[#allocation6 + $0x40] sm:$0xff]  ;;  %594 = vmatpush.msra.mxu3 %v455_v53  ;;  %v460_v53 = vld [vmem:[#allocation6 + $0x668] sm:$0xff] }
  0x5b   : > { %v327_v55 = vld [vmem:[#allocation6 + $0x240] sm:$0xff]  ;;  %534 = vmatpush.msra.mxu0 %v263_v54  ;;  %v1379_v54 = vld.sshfl [vmem:[#allocation1] sm:$0xff pattern:$0x73625140] }
  0x5c   : > { %v387_v56 = vld [vmem:[#allocation6 + $0x420] sm:$0xff]  ;;  %554 = vmatpush.msra.mxu1 %v327_v55  ;;  %v1382_v55 = vld.sshfl [vmem:[#allocation1 + $0x8] sm:$0xff pattern:$0x73625140] }
  0x5d   : > { %v451_v57 = vld [vmem:[#allocation6 + $0x620] sm:$0xff]  ;;  %575 = vmatpush.msra.mxu2 %v387_v56  ;;  %v268_v56 = vld [vmem:[#allocation6 + $0x68] sm:$0xff] }
  0x5e   : > { %v259_v58 = vld [vmem:[#allocation6 + $0x20] sm:$0xff]  ;;  %595 = vmatpush.msra.mxu3 %v451_v57  ;;  %v332_v57 = vld [vmem:[#allocation6 + $0x268] sm:$0xff] }
  0x5f   : > { %v323_v59 = vld [vmem:[#allocation6 + $0x220] sm:$0xff]  ;;  %535 = vmatpush.msra.mxu0 %v259_v58  ;;  %v388_v58 = vld [vmem:[#allocation6 + $0x428] sm:$0xff] }
  0x60   : > { %v383_v60 = vld [vmem:[#allocation6 + $0x400] sm:$0xff]  ;;  %555 = vmatpush.msra.mxu1 %v323_v59  ;;  %v456_v59 = vld [vmem:[#allocation6 + $0x648] sm:$0xff] }
  0x61   : > { %v447_v61 = vld [vmem:[#allocation6 + $0x600] sm:$0xff]  ;;  %576 = vmatpush.msra.mxu2 %v383_v60  ;;  %v264_v60 = vld [vmem:[#allocation6 + $0x48] sm:$0xff] }
  0x62   : > { %v255_v0 = vld [vmem:[#allocation6] sm:$0xff]  ;;  %596 = vmatpush.msra.mxu3 %v447_v61  ;;  %577 = vmatmul.f32.vlgmr.msra.gmra.mxu2 %v1374_v45  ;;  %v328_v61 = vld [vmem:[#allocation6 + $0x248] sm:$0xff] }
  0x63   : > { %v319_v1 = vld [vmem:[#allocation6 + $0x200] sm:$0xff]  ;;  %641 = vmatpush.msrb.mxu2 %v444_v62  ;;  %536 = vmatpush.msra.mxu0 %v255_v0  ;;  %v384_v62 = vld [vmem:[#allocation6 + $0x408] sm:$0xff]  ;;  %v445_v0 = vld [vmem:[#allocation6 + $0x5f0] sm:$0xff] }
  0x64   : > { %661 = vmatpush.msrb.mxu3 %v508_v63  ;;  %556 = vmatpush.msra.mxu1 %v319_v1  ;;  %v1376_v49 = vld.sshfl [vmem:[#allocation1 + $0x18] sm:$0xff pattern:$0x73625140]  ;;  %v452_v63 = vld [vmem:[#allocation6 + $0x628] sm:$0xff] }
  0x65   : > { %642 = vmatpush.msrb.mxu2 %v440_v2  ;;  %601 = vmatpush.msrb.mxu0 %v316_v3  ;;  %v260_v1 = vld [vmem:[#allocation6 + $0x28] sm:$0xff] }
  0x66   : > { %621 = vmatpush.msrb.mxu1 %v380_v4  ;;  %662 = vmatpush.msrb.mxu3 %v504_v5  ;;  %v324_v2 = vld [vmem:[#allocation6 + $0x228] sm:$0xff]  ;;  %v441_v4 = vld [vmem:[#allocation6 + $0x5d0] sm:$0xff] }
  0x67   : > { %643 = vmatpush.msrb.mxu2 %v436_v6  ;;  %602 = vmatpush.msrb.mxu0 %v312_v7  ;;  %v448_v3 = vld [vmem:[#allocation6 + $0x608] sm:$0xff]  ;;  %v509_v5 = vld [vmem:[#allocation6 + $0x7f0] sm:$0xff] }
  0x68   : > { %622 = vmatpush.msrb.mxu1 %v376_v8  ;;  %663 = vmatpush.msrb.mxu3 %v500_v9  ;;  %v256_v6 = vld [vmem:[#allocation6 + $0x8] sm:$0xff]  ;;  %v317_v8 = vld [vmem:[#allocation6 + $0x1f0] sm:$0xff] }
  0x69   : > { %644 = vmatpush.msrb.mxu2 %v432_v10  ;;  %603 = vmatpush.msrb.mxu0 %v308_v11  ;;  %v320_v7 = vld [vmem:[#allocation6 + $0x208] sm:$0xff]  ;;  %v381_v9 = vld [vmem:[#allocation6 + $0x3f0] sm:$0xff] }
  0x6a   : > { %623 = vmatpush.msrb.mxu1 %v372_v13  ;;  %664 = vmatpush.msrb.mxu3 %v496_v14  ;;  %v437_v10 = vld [vmem:[#allocation6 + $0x5b0] sm:$0xff] }
  0x6b   : > { %645 = vmatpush.msrb.mxu2 %v428_v15  ;;  %604 = vmatpush.msrb.mxu0 %v304_v16  ;;  %v505_v11 = vld [vmem:[#allocation6 + $0x7d0] sm:$0xff] }
  0x6c   : > { %624 = vmatpush.msrb.mxu1 %v368_v17  ;;  %665 = vmatpush.msrb.mxu3 %v492_v18  ;;  %v377_v13 = vld [vmem:[#allocation6 + $0x3d0] sm:$0xff] }
  0x6d   : > { %646 = vmatpush.msrb.mxu2 %v424_v19  ;;  %605 = vmatpush.msrb.mxu0 %v300_v20  ;;  %v433_v14 = vld [vmem:[#allocation6 + $0x590] sm:$0xff] }
  0x6e   : > { %625 = vmatpush.msrb.mxu1 %v364_v21  ;;  %666 = vmatpush.msrb.mxu3 %v488_v22  ;;  %v501_v15 = vld [vmem:[#allocation6 + $0x7b0] sm:$0xff] }
  0x6f   : > { %647 = vmatpush.msrb.mxu2 %v420_v23  ;;  %606 = vmatpush.msrb.mxu0 %v296_v24  ;;  %v309_v16 = vld [vmem:[#allocation6 + $0x1b0] sm:$0xff] }
  0x70   : > { %626 = vmatpush.msrb.mxu1 %v360_v25  ;;  %667 = vmatpush.msrb.mxu3 %v484_v26  ;;  %v373_v17 = vld [vmem:[#allocation6 + $0x3b0] sm:$0xff] }
  0x71   : > { %648 = vmatpush.msrb.mxu2 %v416_v27  ;;  %607 = vmatpush.msrb.mxu0 %v292_v28  ;;  %v429_v18 = vld [vmem:[#allocation6 + $0x570] sm:$0xff] }
  0x72   : > { %627 = vmatpush.msrb.mxu1 %v356_v29  ;;  %668 = vmatpush.msrb.mxu3 %v480_v30  ;;  %v497_v19 = vld [vmem:[#allocation6 + $0x790] sm:$0xff] }
  0x73   : > { %649 = vmatpush.msrb.mxu2 %v412_v31  ;;  %608 = vmatpush.msrb.mxu0 %v288_v32  ;;  %v305_v20 = vld [vmem:[#allocation6 + $0x190] sm:$0xff] }
  0x74   : > { %628 = vmatpush.msrb.mxu1 %v352_v33  ;;  %669 = vmatpush.msrb.mxu3 %v476_v34  ;;  %v369_v21 = vld [vmem:[#allocation6 + $0x390] sm:$0xff] }
  0x75   : > { %650 = vmatpush.msrb.mxu2 %v408_v35  ;;  %609 = vmatpush.msrb.mxu0 %v284_v36  ;;  %v425_v22 = vld [vmem:[#allocation6 + $0x550] sm:$0xff] }
  0x76   : > { %629 = vmatpush.msrb.mxu1 %v348_v37  ;;  %670 = vmatpush.msrb.mxu3 %v472_v38  ;;  %v493_v23 = vld [vmem:[#allocation6 + $0x770] sm:$0xff] }
  0x77   : > { %651 = vmatpush.msrb.mxu2 %v404_v39  ;;  %610 = vmatpush.msrb.mxu0 %v280_v40  ;;  %v301_v24 = vld [vmem:[#allocation6 + $0x170] sm:$0xff] }
  0x78   : > { %630 = vmatpush.msrb.mxu1 %v344_v41  ;;  %671 = vmatpush.msrb.mxu3 %v468_v42  ;;  %v365_v25 = vld [vmem:[#allocation6 + $0x370] sm:$0xff] }
  0x79   : > { %652 = vmatpush.msrb.mxu2 %v400_v43  ;;  %611 = vmatpush.msrb.mxu0 %v276_v44  ;;  %v421_v26 = vld [vmem:[#allocation6 + $0x530] sm:$0xff] }
  0x7a   : > { %631 = vmatpush.msrb.mxu1 %v340_v46  ;;  %672 = vmatpush.msrb.mxu3 %v464_v48  ;;  %v489_v27 = vld [vmem:[#allocation6 + $0x750] sm:$0xff] }
  0x7b   : > { %653 = vmatpush.msrb.mxu2 %v396_v47  ;;  %597 = vmatmul.f32.vlgmr.msra.gmra.mxu3 %v1376_v49  ;;  %v297_v28 = vld [vmem:[#allocation6 + $0x150] sm:$0xff] }
  0x7c   : > { %612 = vmatpush.msrb.mxu0 %v272_v50  ;;  %632 = vmatpush.msrb.mxu1 %v336_v51  ;;  %v361_v29 = vld [vmem:[#allocation6 + $0x350] sm:$0xff] }
  0x7d   : > { %654 = vmatpush.msrb.mxu2 %v392_v52  ;;  %673 = vmatpush.msrb.mxu3 %v460_v53  ;;  %v417_v30 = vld [vmem:[#allocation6 + $0x510] sm:$0xff] }
  0x7e   : > { %537 = vmatmul.f32.vlgmr.msra.gmra.mxu0 %v1379_v54  ;;  %557 = vmatmul.f32.vlgmr.msra.gmra.mxu1 %v1382_v55  ;;  %v485_v31 = vld [vmem:[#allocation6 + $0x730] sm:$0xff] }
  0x7f   : > { %613 = vmatpush.msrb.mxu0 %v268_v56  ;;  %633 = vmatpush.msrb.mxu1 %v332_v57  ;;  %v293_v32 = vld [vmem:[#allocation6 + $0x130] sm:$0xff] }
  0x80   : > { %655 = vmatpush.msrb.mxu2 %v388_v58  ;;  %674 = vmatpush.msrb.mxu3 %v456_v59  ;;  %v357_v33 = vld [vmem:[#allocation6 + $0x330] sm:$0xff] }
  0x81   : > { %614 = vmatpush.msrb.mxu0 %v264_v60  ;;  %634 = vmatpush.msrb.mxu1 %v328_v61  ;;  %v413_v34 = vld [vmem:[#allocation6 + $0x4f0] sm:$0xff] }
  0x82   : > { %656 = vmatpush.msrb.mxu2 %v384_v62  ;;  %675 = vmatpush.msrb.mxu3 %v452_v63  ;;  %v481_v35 = vld [vmem:[#allocation6 + $0x710] sm:$0xff] }
  0x83   : > { %657 = vmatmul.f32.vlgmr.msrb.gmra.mxu2 %v1374_v45  ;;  %615 = vmatpush.msrb.mxu0 %v260_v1  ;;  %v289_v36 = vld [vmem:[#allocation6 + $0x110] sm:$0xff] }
  0x84   : > { %721 = vmatpush.msra.mxu2 %v445_v0  ;;  %635 = vmatpush.msrb.mxu1 %v324_v2  ;;  %v353_v37 = vld [vmem:[#allocation6 + $0x310] sm:$0xff] }
  0x85   : > { %676 = vmatpush.msrb.mxu3 %v448_v3  ;;  %616 = vmatpush.msrb.mxu0 %v256_v6  ;;  %v409_v38 = vld [vmem:[#allocation6 + $0x4d0] sm:$0xff] }
  0x86   : > { %677 = vmatmul.f32.vlgmr.msrb.gmra.mxu3 %v1376_v49  ;;  %722 = vmatpush.msra.mxu2 %v441_v4  ;;  %v477_v39 = vld [vmem:[#allocation6 + $0x6f0] sm:$0xff]  ;;  %v446_v4 = vld [vmem:[#allocation6 + $0x5f8] sm:$0xff] }
  0x87   : > { %741 = vmatpush.msra.mxu3 %v509_v5  ;;  %636 = vmatpush.msrb.mxu1 %v320_v7  ;;  %v285_v40 = vld [vmem:[#allocation6 + $0xf0] sm:$0xff] }
  0x88   : > { %617 = vmatmul.f32.vlgmr.msrb.gmra.mxu0 %v1379_v54  ;;  %637 = vmatmul.f32.vlgmr.msrb.gmra.mxu1 %v1382_v55  ;;  %v349_v41 = vld [vmem:[#allocation6 + $0x2f0] sm:$0xff] }
  0x89   : > { %681 = vmatpush.msra.mxu0 %v317_v8  ;;  %701 = vmatpush.msra.mxu1 %v381_v9  ;;  %v405_v42 = vld [vmem:[#allocation6 + $0x4b0] sm:$0xff]  ;;  %v442_v8 = vld [vmem:[#allocation6 + $0x5d8] sm:$0xff] }
  0x8a   : > { %723 = vmatpush.msra.mxu2 %v437_v10  ;;  %742 = vmatpush.msra.mxu3 %v505_v11  ;;  %v473_v43 = vld [vmem:[#allocation6 + $0x6d0] sm:$0xff]  ;;  %v510_v9 = vld [vmem:[#allocation6 + $0x7f8] sm:$0xff] }
  0x8b   : > { %682 = vmatpush.msra.mxu0 %v313_v12  ;;  %702 = vmatpush.msra.mxu1 %v377_v13  ;;  %v281_v44 = vld [vmem:[#allocation6 + $0xd0] sm:$0xff]  ;;  %v318_v12 = vld [vmem:[#allocation6 + $0x1f8] sm:$0xff] }
  0x8c   : > { %724 = vmatpush.msra.mxu2 %v433_v14  ;;  %743 = vmatpush.msra.mxu3 %v501_v15  ;;  %v345_v46 = vld [vmem:[#allocation6 + $0x2d0] sm:$0xff]  ;;  %v382_v13 = vld [vmem:[#allocation6 + $0x3f8] sm:$0xff] }
  0x8d   : > { %683 = vmatpush.msra.mxu0 %v309_v16  ;;  %703 = vmatpush.msra.mxu1 %v373_v17  ;;  %v401_v47 = vld [vmem:[#allocation6 + $0x490] sm:$0xff]  ;;  %v438_v14 = vld [vmem:[#allocation6 + $0x5b8] sm:$0xff] }
  0x8e   : > { %725 = vmatpush.msra.mxu2 %v429_v18  ;;  %744 = vmatpush.msra.mxu3 %v497_v19  ;;  %v469_v48 = vld [vmem:[#allocation6 + $0x6b0] sm:$0xff]  ;;  %v506_v15 = vld [vmem:[#allocation6 + $0x7d8] sm:$0xff] }
  0x8f   : > { %684 = vmatpush.msra.mxu0 %v305_v20  ;;  %704 = vmatpush.msra.mxu1 %v369_v21  ;;  %v277_v50 = vld [vmem:[#allocation6 + $0xb0] sm:$0xff]  ;;  %v314_v16 = vld [vmem:[#allocation6 + $0x1d8] sm:$0xff] }
  0x90   : > { %726 = vmatpush.msra.mxu2 %v425_v22  ;;  %745 = vmatpush.msra.mxu3 %v493_v23  ;;  %v341_v51 = vld [vmem:[#allocation6 + $0x2b0] sm:$0xff]  ;;  %v378_v17 = vld [vmem:[#allocation6 + $0x3d8] sm:$0xff] }
  0x91   : > { %685 = vmatpush.msra.mxu0 %v301_v24  ;;  %705 = vmatpush.msra.mxu1 %v365_v25  ;;  %v397_v52 = vld [vmem:[#allocation6 + $0x470] sm:$0xff]  ;;  %v434_v18 = vld [vmem:[#allocation6 + $0x598] sm:$0xff] }
  0x92   : > { %727 = vmatpush.msra.mxu2 %v421_v26  ;;  %746 = vmatpush.msra.mxu3 %v489_v27  ;;  %v465_v53 = vld [vmem:[#allocation6 + $0x690] sm:$0xff]  ;;  %v502_v19 = vld [vmem:[#allocation6 + $0x7b8] sm:$0xff] }
  0x93   : > { %686 = vmatpush.msra.mxu0 %v297_v28  ;;  %706 = vmatpush.msra.mxu1 %v361_v29  ;;  %v273_v56 = vld [vmem:[#allocation6 + $0x90] sm:$0xff]  ;;  %v310_v20 = vld [vmem:[#allocation6 + $0x1b8] sm:$0xff] }
  0x94   : > { %728 = vmatpush.msra.mxu2 %v417_v30  ;;  %747 = vmatpush.msra.mxu3 %v485_v31  ;;  %v337_v57 = vld [vmem:[#allocation6 + $0x290] sm:$0xff]  ;;  %v374_v21 = vld [vmem:[#allocation6 + $0x3b8] sm:$0xff] }
  0x95   : > { %687 = vmatpush.msra.mxu0 %v293_v32  ;;  %707 = vmatpush.msra.mxu1 %v357_v33  ;;  %v393_v58 = vld [vmem:[#allocation6 + $0x450] sm:$0xff]  ;;  %v430_v22 = vld [vmem:[#allocation6 + $0x578] sm:$0xff] }
  0x96   : > { %729 = vmatpush.msra.mxu2 %v413_v34  ;;  %748 = vmatpush.msra.mxu3 %v481_v35  ;;  %v461_v59 = vld [vmem:[#allocation6 + $0x670] sm:$0xff]  ;;  %v498_v23 = vld [vmem:[#allocation6 + $0x798] sm:$0xff] }
  0x97   : > { %688 = vmatpush.msra.mxu0 %v289_v36  ;;  %708 = vmatpush.msra.mxu1 %v353_v37  ;;  %v269_v60 = vld [vmem:[#allocation6 + $0x70] sm:$0xff]  ;;  %v306_v24 = vld [vmem:[#allocation6 + $0x198] sm:$0xff] }
  0x98   : > { %730 = vmatpush.msra.mxu2 %v409_v38  ;;  %749 = vmatpush.msra.mxu3 %v477_v39  ;;  %v333_v61 = vld [vmem:[#allocation6 + $0x270] sm:$0xff]  ;;  %v370_v25 = vld [vmem:[#allocation6 + $0x398] sm:$0xff] }
  0x99   : > { %689 = vmatpush.msra.mxu0 %v285_v40  ;;  %709 = vmatpush.msra.mxu1 %v349_v41  ;;  %v389_v62 = vld [vmem:[#allocation6 + $0x430] sm:$0xff]  ;;  %v426_v26 = vld [vmem:[#allocation6 + $0x558] sm:$0xff] }
  0x9a   : > { %731 = vmatpush.msra.mxu2 %v405_v42  ;;  %750 = vmatpush.msra.mxu3 %v473_v43  ;;  %v457_v63 = vld [vmem:[#allocation6 + $0x650] sm:$0xff]  ;;  %v494_v27 = vld [vmem:[#allocation6 + $0x778] sm:$0xff] }
  0x9b   : > { %690 = vmatpush.msra.mxu0 %v281_v44  ;;  %710 = vmatpush.msra.mxu1 %v345_v46  ;;  %v265_v0 = vld [vmem:[#allocation6 + $0x50] sm:$0xff]  ;;  %v302_v28 = vld [vmem:[#allocation6 + $0x178] sm:$0xff] }
  0x9c   : > { %732 = vmatpush.msra.mxu2 %v401_v47  ;;  %751 = vmatpush.msra.mxu3 %v469_v48  ;;  %v329_v1 = vld [vmem:[#allocation6 + $0x250] sm:$0xff]  ;;  %v366_v29 = vld [vmem:[#allocation6 + $0x378] sm:$0xff] }
  0x9d   : > { %691 = vmatpush.msra.mxu0 %v277_v50  ;;  %711 = vmatpush.msra.mxu1 %v341_v51  ;;  %v385_v2 = vld [vmem:[#allocation6 + $0x410] sm:$0xff]  ;;  %v422_v30 = vld [vmem:[#allocation6 + $0x538] sm:$0xff] }
  0x9e   : > { %733 = vmatpush.msra.mxu2 %v397_v52  ;;  %752 = vmatpush.msra.mxu3 %v465_v53  ;;  %v453_v3 = vld [vmem:[#allocation6 + $0x630] sm:$0xff]  ;;  %v490_v31 = vld [vmem:[#allocation6 + $0x758] sm:$0xff] }
  0x9f   : > { %692 = vmatpush.msra.mxu0 %v273_v56  ;;  %712 = vmatpush.msra.mxu1 %v337_v57  ;;  %v261_v5 = vld [vmem:[#allocation6 + $0x30] sm:$0xff]  ;;  %v298_v32 = vld [vmem:[#allocation6 + $0x158] sm:$0xff] }
  0xa0   : > { %734 = vmatpush.msra.mxu2 %v393_v58  ;;  %753 = vmatpush.msra.mxu3 %v461_v59  ;;  %v325_v6 = vld [vmem:[#allocation6 + $0x230] sm:$0xff]  ;;  %v362_v33 = vld [vmem:[#allocation6 + $0x358] sm:$0xff] }
  0xa1   : > { %693 = vmatpush.msra.mxu0 %v269_v60  ;;  %713 = vmatpush.msra.mxu1 %v333_v61  ;;  %v449_v7 = vld [vmem:[#allocation6 + $0x610] sm:$0xff]  ;;  %v418_v34 = vld [vmem:[#allocation6 + $0x518] sm:$0xff] }
  0xa2   : > { %735 = vmatpush.msra.mxu2 %v389_v62  ;;  %754 = vmatpush.msra.mxu3 %v457_v63  ;;  %v257_v10 = vld [vmem:[#allocation6 + $0x10] sm:$0xff]  ;;  %v486_v35 = vld [vmem:[#allocation6 + $0x738] sm:$0xff] }
  0xa3   : > { %694 = vmatpush.msra.mxu0 %v265_v0  ;;  %714 = vmatpush.msra.mxu1 %v329_v1  ;;  %v321_v11 = vld [vmem:[#allocation6 + $0x210] sm:$0xff]  ;;  %v294_v36 = vld [vmem:[#allocation6 + $0x138] sm:$0xff] }
  0xa4   : > { %736 = vmatpush.msra.mxu2 %v385_v2  ;;  %755 = vmatpush.msra.mxu3 %v453_v3  ;;  %v358_v37 = vld [vmem:[#allocation6 + $0x338] sm:$0xff] }
  0xa5   : > { %695 = vmatpush.msra.mxu0 %v261_v5  ;;  %715 = vmatpush.msra.mxu1 %v325_v6  ;;  %v414_v38 = vld [vmem:[#allocation6 + $0x4f8] sm:$0xff] }
  0xa6   : > { %801 = vmatpush.msrb.mxu2 %v446_v4  ;;  %756 = vmatpush.msra.mxu3 %v449_v7  ;;  %v482_v39 = vld [vmem:[#allocation6 + $0x718] sm:$0xff] }
  0xa7   : > { %696 = vmatpush.msra.mxu0 %v257_v10  ;;  %716 = vmatpush.msra.mxu1 %v321_v11  ;;  %v290_v40 = vld [vmem:[#allocation6 + $0x118] sm:$0xff] }
  0xa8   : > { %802 = vmatpush.msrb.mxu2 %v442_v8  ;;  %821 = vmatpush.msrb.mxu3 %v510_v9  ;;  %v354_v41 = vld [vmem:[#allocation6 + $0x318] sm:$0xff] }
  0xa9   : > { %761 = vmatpush.msrb.mxu0 %v318_v12  ;;  %781 = vmatpush.msrb.mxu1 %v382_v13  ;;  %v410_v42 = vld [vmem:[#allocation6 + $0x4d8] sm:$0xff]  ;;  %v1242_v13 = vmov 0  }
  0xaa   : > { %803 = vmatpush.msrb.mxu2 %v438_v14  ;;  %822 = vmatpush.msrb.mxu3 %v506_v15  ;;  %v478_v43 = vld [vmem:[#allocation6 + $0x6f8] sm:$0xff]  ;;  %v861_v14 = vld [vmem:[%s1443_s2] sm:$0x3] }
  0xab   : > { %762 = vmatpush.msrb.mxu0 %v314_v16  ;;  %782 = vmatpush.msrb.mxu1 %v378_v17  ;;  %v286_v44 = vld [vmem:[#allocation6 + $0xf8] sm:$0xff] }
  0xac   : > { %804 = vmatpush.msrb.mxu2 %v434_v18  ;;  %823 = vmatpush.msrb.mxu3 %v502_v19  ;;  %v350_v46 = vld [vmem:[#allocation6 + $0x2f8] sm:$0xff] }
  0xad   : > { %763 = vmatpush.msrb.mxu0 %v310_v20  ;;  %783 = vmatpush.msrb.mxu1 %v374_v21  ;;  %v406_v47 = vld [vmem:[#allocation6 + $0x4b8] sm:$0xff] }
  0xae   : > { %805 = vmatpush.msrb.mxu2 %v430_v22  ;;  %824 = vmatpush.msrb.mxu3 %v498_v23  ;;  %v474_v48 = vld [vmem:[#allocation6 + $0x6d8] sm:$0xff] }
  0xaf   : > { %764 = vmatpush.msrb.mxu0 %v306_v24  ;;  %784 = vmatpush.msrb.mxu1 %v370_v25  ;;  %v282_v50 = vld [vmem:[#allocation6 + $0xd8] sm:$0xff] }
  0xb0   : > { %806 = vmatpush.msrb.mxu2 %v426_v26  ;;  %825 = vmatpush.msrb.mxu3 %v494_v27  ;;  %v346_v51 = vld [vmem:[#allocation6 + $0x2d8] sm:$0xff] }
  0xb1   : > { %765 = vmatpush.msrb.mxu0 %v302_v28  ;;  %785 = vmatpush.msrb.mxu1 %v366_v29  ;;  %v402_v52 = vld [vmem:[#allocation6 + $0x498] sm:$0xff]  ;;  %v1243_v29 = vmov 269488144  }
  0xb2   : > { %807 = vmatpush.msrb.mxu2 %v422_v30  ;;  %826 = vmatpush.msrb.mxu3 %v490_v31  ;;  %v470_v53 = vld [vmem:[#allocation6 + $0x6b8] sm:$0xff]  ;;  %v867_v30 = vunpack.c.l.s4 %v1243_v29 }
  0xb3   : > { %766 = vmatpush.msrb.mxu0 %v298_v32  ;;  %786 = vmatpush.msrb.mxu1 %v362_v33  ;;  %v278_v56 = vld [vmem:[#allocation6 + $0xb8] sm:$0xff] }
  0xb4   : > { %808 = vmatpush.msrb.mxu2 %v418_v34  ;;  %827 = vmatpush.msrb.mxu3 %v486_v35  ;;  %v342_v57 = vld [vmem:[#allocation6 + $0x2b8] sm:$0xff] }
  0xb5   : > { %767 = vmatpush.msrb.mxu0 %v294_v36  ;;  %787 = vmatpush.msrb.mxu1 %v358_v37  ;;  %v398_v58 = vld [vmem:[#allocation6 + $0x478] sm:$0xff] }
  0xb6   : > { %809 = vmatpush.msrb.mxu2 %v414_v38  ;;  %828 = vmatpush.msrb.mxu3 %v482_v39  ;;  %v466_v59 = vld [vmem:[#allocation6 + $0x698] sm:$0xff]  ;;  %v868_v38 = vunpack.c.0.s8 %v867_v30 }
  0xb7   : > { %768 = vmatpush.msrb.mxu0 %v290_v40  ;;  %788 = vmatpush.msrb.mxu1 %v354_v41  ;;  %v274_v60 = vld [vmem:[#allocation6 + $0x98] sm:$0xff] }
  0xb8   : > { %810 = vmatpush.msrb.mxu2 %v410_v42  ;;  %829 = vmatpush.msrb.mxu3 %v478_v43  ;;  %v338_v61 = vld [vmem:[#allocation6 + $0x298] sm:$0xff] }
  0xb9   : > { %769 = vmatpush.msrb.mxu0 %v286_v44  ;;  %789 = vmatpush.msrb.mxu1 %v350_v46  ;;  %v394_v62 = vld [vmem:[#allocation6 + $0x458] sm:$0xff] }
  0xba   : > { %811 = vmatpush.msrb.mxu2 %v406_v47  ;;  %830 = vmatpush.msrb.mxu3 %v474_v48  ;;  %v462_v63 = vld [vmem:[#allocation6 + $0x678] sm:$0xff] }
  0xbb   : > { %770 = vmatpush.msrb.mxu0 %v282_v50  ;;  %790 = vmatpush.msrb.mxu1 %v346_v51  ;;  %v270_v0 = vld [vmem:[#allocation6 + $0x78] sm:$0xff] }
  0xbc   : > { %812 = vmatpush.msrb.mxu2 %v402_v52  ;;  %831 = vmatpush.msrb.mxu3 %v470_v53  ;;  %v334_v1 = vld [vmem:[#allocation6 + $0x278] sm:$0xff] }
  0xbd   : > { %737 = vmatmul.f32.vlgmr.msra.gmra.mxu2 %v1374_v45  ;;  %771 = vmatpush.msrb.mxu0 %v278_v56  ;;  %v390_v2 = vld [vmem:[#allocation6 + $0x438] sm:$0xff] }
  0xbe   : > { %791 = vmatpush.msrb.mxu1 %v342_v57  ;;  %813 = vmatpush.msrb.mxu2 %v398_v58  ;;  %v458_v3 = vld [vmem:[#allocation6 + $0x658] sm:$0xff] }
  0xbf   : > { %832 = vmatpush.msrb.mxu3 %v466_v59  ;;  %772 = vmatpush.msrb.mxu0 %v274_v60  ;;  %v266_v4 = vld [vmem:[#allocation6 + $0x58] sm:$0xff] }
  0xc0   : > { %757 = vmatmul.f32.vlgmr.msra.gmra.mxu3 %v1376_v49  ;;  %792 = vmatpush.msrb.mxu1 %v338_v61  ;;  %v330_v5 = vld [vmem:[#allocation6 + $0x258] sm:$0xff] }
  0xc1   : > { %814 = vmatpush.msrb.mxu2 %v394_v62  ;;  %833 = vmatpush.msrb.mxu3 %v462_v63  ;;  %v386_v6 = vld [vmem:[#allocation6 + $0x418] sm:$0xff] }
  0xc2   : > { %697 = vmatmul.f32.vlgmr.msra.gmra.mxu0 %v1379_v54  ;;  %717 = vmatmul.f32.vlgmr.msra.gmra.mxu1 %v1382_v55  ;;  %v454_v7 = vld [vmem:[#allocation6 + $0x638] sm:$0xff] }
  0xc3   : > { %773 = vmatpush.msrb.mxu0 %v270_v0  ;;  %793 = vmatpush.msrb.mxu1 %v334_v1  ;;  %v262_v8 = vld [vmem:[#allocation6 + $0x38] sm:$0xff] }
  0xc4   : > { %815 = vmatpush.msrb.mxu2 %v390_v2  ;;  %834 = vmatpush.msrb.mxu3 %v458_v3  ;;  %v326_v9 = vld [vmem:[#allocation6 + $0x238] sm:$0xff] }
  0xc5   : > { %774 = vmatpush.msrb.mxu0 %v266_v4  ;;  %794 = vmatpush.msrb.mxu1 %v330_v5  ;;  %v450_v10 = vld [vmem:[#allocation6 + $0x618] sm:$0xff] }
  0xc6   : > { %816 = vmatpush.msrb.mxu2 %v386_v6  ;;  %835 = vmatpush.msrb.mxu3 %v454_v7  ;;  %v258_v11 = vld [vmem:[#allocation6 + $0x18] sm:$0xff] }
  0xc7   : > { %817 = vmatmul.f32.vlgmr.msrb.gmra.mxu2 %v1374_v45  ;;  %775 = vmatpush.msrb.mxu0 %v262_v8  ;;  %v322_v12 = vld [vmem:[#allocation6 + $0x218] sm:$0xff] }
  0xc8   : > { %795 = vmatpush.msrb.mxu1 %v326_v9  ;;  %836 = vmatpush.msrb.mxu3 %v450_v10 }
  0xc9   : > { %1090 = vset.pattern.permute.xlu0 %v1242_v13  ;;  %837 = vmatmul.f32.vlgmr.msrb.gmra.mxu3 %v1376_v49 }
  0xca   : > { %776 = vmatpush.msrb.mxu0 %v258_v11  ;;  %796 = vmatpush.msrb.mxu1 %v322_v12 }
  0xcb   : > { %777 = vmatmul.f32.vlgmr.msrb.gmra.mxu0 %v1379_v54  ;;  %797 = vmatmul.f32.vlgmr.msrb.gmra.mxu1 %v1382_v55 }
  0xcc   : > { %864 = vperm.xlu0 %1090, %v861_v14  }
  0xe5   : > { %v578_v16 = vpop.f32.mrf.mxu2 }
  0xfb   : > { %v538_v45 = vpop.f32.mrf.mxu0  ;;  %v558_v15 = vpop.f32.mrf.mxu1 }
  0xfc   : > { %v559_v54 = vadd.f32 %v558_v15, %v538_v45 }
  0xfe   : > { %v598_v17 = vpop.f32.mrf.mxu3  ;;  %v579_v35 = vadd.f32 %v578_v16, %v559_v54 }
 0x100   : > { %v599_v43 = vadd.f32 %v598_v17, %v579_v35 }
 0x105   : > { %v618_v18 = vpop.f32.mrf.mxu0  ;;  %v638_v19 = vpop.f32.mrf.mxu1 }
 0x106   : > { %v658_v20 = vpop.f32.mrf.mxu2  ;;  %v639_v49 = vadd.f32 %v638_v19, %v618_v18 }
 0x108   : > { %v659_v27 = vadd.f32 %v658_v20, %v639_v49 }
 0x109   : > { %v678_v21 = vpop.f32.mrf.mxu3 }
 0x10a   : > { %v679_v32 = vadd.f32 %v678_v21, %v659_v27 }
 0x10c   : > { %v845_v41 = vrot.slane %v679_v32, 6 }
 0x10e   : > { %v849_v48 = vsel %vm848_vm0, %v599_v43, %v845_v41 }
 0x13e   : > { %v865_v40 = vpop.permute.xlu0 %864 }
 0x13f   : > { %v698_v22 = vpop.f32.mrf.mxu0  ;;  %v718_v23 = vpop.f32.mrf.mxu1  ;;  %v869_v47 = vperm.slane %v865_v40, %v868_v38 }
 0x140   : > { %v738_v24 = vpop.f32.mrf.mxu2  ;;  %v719_v26 = vadd.f32 %v718_v23, %v698_v22 }
 0x142   : > { %v739_v28 = vadd.f32 %v738_v24, %v719_v26 }
 0x143   : > { %v758_v25 = vpop.f32.mrf.mxu3 }
 0x144   : > { %v759_v36 = vadd.f32 %v758_v25, %v739_v28 }
 0x146   : > { %v846_v44 = vrot.slane %v759_v36, 4 }
 0x148   : > { %v778_v55 = vpop.f32.mrf.mxu0  ;;  %v798_v31 = vpop.f32.mrf.mxu1 }
 0x149   : > { %v799_v33 = vadd.f32 %v798_v31, %v778_v55 }
 0x14a   : > { %v818_v34 = vpop.f32.mrf.mxu2 }
 0x14b   : > { %v819_v37 = vadd.f32 %v818_v34, %v799_v33 }
 0x14c   : > { %v838_v39 = vpop.f32.mrf.mxu3 }
 0x14d   : > { %v839_v42 = vadd.f32 %v838_v39, %v819_v37 }
 0x14f   : > { %v847_v46 = vrot.slane %v839_v42, 2 }
 0x151   : > { %v851_v50 = vsel %vm850_vm1, %v846_v44, %v847_v46 }
 0x152   : > { %v853_v51 = vsel %vm852_vm2, %v849_v48, %v851_v50 }
 0x153   : > { %v871_v52 = vadd.f32 %v869_v47, %v853_v51 }
 0x155   : > { %872 = vst [vmem:[%s243_s15] sm:$0xff] %v871_v52 }
 0x156   : > { %1178 = shalt.err (!%p1175_p13)
}
 0x157   : > { %1019 = dma.vmem_to_hbm [thread:$0]  (%p1335_p4), %s890_s21, 128, %s892_s22, %s874_s18  }
 0x158 PF: > { %s903_s28 = sand.u32 1, %s1217_s12   ;;  %p1030_p0 = pnand %p998_p6, %p1343_p7 }
 0x159   : > { %s904_s19 = scalar_lea.sflag [#allocation5], %s903_s28 }
 0x15a   : > { %p1031_p2 = pneg %p1030_p0 }
 0x15c   : > { %1212 = dma.done.wait (%p1031_p2), %s904_s19, 128  }
 0x15d   : > { %1214 = vsyncadd (%p1031_p2), %s904_s19, 4294967168  ;;  %s20_s17 = sadd.s32 1, %s1237_s17   ;;  %s1451_s12 = smov %s1221_s13 }
 0x15e   : > { %p17_p5 = scmp.ge.s32.totalorder %s20_s17, 4   ;;  %s1452_s13 = smov %s1225_s14 }
 0x15f   : > { %s1453_s14 = smov %s1341_s8  ;;  %s1454_s15 = smov %s1233_s16 }
 0x160   : > { %s1455_s16 = smov %s1457_s29  ;;  %19 = sbr.rel (!%p17_p5) target bundleno = 7 (0x7), region = 90 }
 0x165   :  { %910 = vsyncpa [#allocation4], 1 }
 0x166   :  { %912 = vsyncpa [#allocation4 + $0x1], 1 }
 0x167   :  { %913 = vsyncpa [#allocation7], 1 }
 0x168   :  { %914 = vsyncpa [#allocation5], 1 }
 0x169   :  { %916 = vsyncpa [#allocation5 + $0x1], 1 }

</bundles_post_ra>
